<compile_context>
chip_gen: v7x
topology: tpu7x:2x2x1
jax: 0.10.0
libtpu: 0.0.40
codegen_flags: <defaults>
</compile_context>

<pallas_src>
import jax
import jax.numpy as jnp
from jax.experimental import pallas as pl
from jax.experimental.pallas import tpu as pltpu


def _bow_linear_kernel(x_ref, w_ref, b_ref, o_ref):
    # x_ref: (TM, W) native dtype, w_ref: (W, C) same dtype,
    # b_ref: (1, 1) f32 in SMEM, o_ref: (TM, C) out dtype.
    y = jnp.dot(x_ref[...], w_ref[...], preferred_element_type=jnp.float32)
    o_ref[...] = (y + b_ref[0, 0]).astype(o_ref.dtype)


def _pick_row_tile(rows, width, x_itemsize, out_cols, out_itemsize,
                   vmem_budget_bytes=24 << 20, target_x_bytes=2 << 20):
    """Row tile sized by bytes with lane-padded VMEM accounting."""
    LANE, SUB = 128, 8
    # VMEM blocks are lane-padded to 128 in the minor dim.
    x_row_vmem = pl.cdiv(width, LANE) * LANE * x_itemsize
    o_row_vmem = pl.cdiv(out_cols, LANE) * LANE * out_itemsize
    w_vmem = pl.cdiv(width, SUB) * SUB * LANE * x_itemsize        # resident weight
    # 2 x-buffers + 2 out-buffers + weight must fit the budget.
    rows_by_vmem = max(SUB, (vmem_budget_bytes - w_vmem) // (2 * (x_row_vmem + o_row_vmem)))
    # Target ~2 MiB of actual x data per step so DMA time dwarfs step overhead.
    rows_by_target = max(SUB, target_x_bytes // max(1, width * x_itemsize))
    # Keep >= ~4 grid steps when possible (pipeline warm-up / multi-core split).
    tm = min(rows_by_vmem, rows_by_target, max(SUB, pl.cdiv(rows, 4)))
    return int(max(SUB, (tm // SUB) * SUB))


def bow_linear(x, weight, bias, *, row_tile=None):
    """x: (..., F) float array; weight: (1, F) (nn.Linear layout); bias: (1,).
    Returns (N, 2): column 0 zeros, column 1 = x @ weight.T + bias."""
    num_features = weight.shape[1]
    out_dtype = x.dtype
    x2d = x.reshape(-1, num_features)
    n = x2d.shape[0]

    # Row packing: fold 128/F logical rows into one lane-dense 128-wide row.
    pack = 1
    if num_features < 128 and 128 % num_features == 0:
        p = 128 // num_features
        if n % p == 0:
            pack = p

    if pack > 1:
        width = num_features * pack                                  # == 128
        rows = n // pack
        x_in = x2d.reshape(rows, width)                              # free reshape
        w_col = weight.reshape(num_features, 1).astype(x2d.dtype)
        w_in = jnp.kron(jnp.eye(pack, dtype=x2d.dtype), w_col)       # (128, pack) block-diag
    else:
        width = num_features
        rows = n
        x_in = x2d
        w_in = weight.reshape(num_features, 1).astype(x2d.dtype)     # (F, 1)
    out_cols = pack

    b = bias.reshape(1, 1).astype(jnp.float32)

    tm = row_tile if row_tile is not None else _pick_row_tile(
        rows, width, x_in.dtype.itemsize, out_cols, jnp.dtype(out_dtype).itemsize)
    grid = (pl.cdiv(rows, tm),)   # ragged last tile: Pallas clips the writeback

    y = pl.pallas_call(
        _bow_linear_kernel,
        out_shape=jax.ShapeDtypeStruct((rows, out_cols), out_dtype),
        grid=grid,
        in_specs=[
            pl.BlockSpec((tm, width), lambda i: (i, 0)),             # x rows, pipelined
            pl.BlockSpec((width, out_cols), lambda i: (0, 0)),       # weight, resident
            pl.BlockSpec((1, 1), lambda i: (0, 0), memory_space=pltpu.SMEM),  # bias
        ],
        out_specs=pl.BlockSpec((tm, out_cols), lambda i: (i, 0)),
        compiler_params=pltpu.CompilerParams(
            dimension_semantics=("parallel",),
            vmem_limit_bytes=32 << 20,
        ),
    )(x_in, w_in, b)

    y = y.reshape(n, 1)                      # free reshape back to one y per row
    return jnp.pad(y, ((0, 0), (1, 0)))      # (N, 2): zero column + y column


if __name__ == "__main__":
    num_features = 32
    key = jax.random.PRNGKey(0)
    kx, kw, kb = jax.random.split(key, 3)

    bound = 1.0 / (num_features ** 0.5)
    weight = jax.random.uniform(kw, (1, num_features), jnp.float32, -bound, bound)
    bias = jax.random.uniform(kb, (1,), jnp.float32, -bound, bound)

    def reference(xx):
        y = (xx.reshape(-1, num_features).astype(jnp.float32)
             @ weight.T + bias).reshape(-1, 1)
        return jnp.concatenate([jnp.zeros_like(y), y], axis=1)

    # 1) Packed path (N=40 divisible by 128/F=4), forced tiny tile -> 2-step
    #    grid with a ragged last block (10 packed rows = 8 + 2).
    x = jax.random.normal(kx, (5, 8, num_features), dtype=jnp.float32)
    out = jax.block_until_ready(bow_linear(x, weight, bias, row_tile=8))
    assert out.shape == (40, 2)
    assert jnp.allclose(out, reference(x), atol=1e-5), "mismatch (packed f32)"

    # 2) Fallback (unpacked) path: N=21 not divisible by 4; 3-step grid with a
    #    ragged tail tile (21 = 8 + 8 + 5).
    x2 = jax.random.normal(kx, (3, 7, num_features), dtype=jnp.float32)
    out2 = jax.block_until_ready(bow_linear(x2, weight, bias, row_tile=8))
    assert out2.shape == (21, 2)
    assert jnp.allclose(out2, reference(x2), atol=1e-5), "mismatch (unpacked f32)"

    # 3) bf16 on the wire, automatic byte-based tile sizing.
    xb = x.astype(jnp.bfloat16)
    out_b = jax.block_until_ready(bow_linear(xb, weight, bias))
    ref_b = reference(xb.astype(jnp.float32))
    assert out_b.shape == (40, 2)
    assert jnp.allclose(out_b.astype(jnp.float32), ref_b, atol=5e-2), "mismatch (bf16)"

    print("KERNEL_OK")
</pallas_src>

<mosaic_0001>
module attributes {stable_mosaic.version = 11 : i64} {
  func.func @_bow_linear_kernel(%arg0: i32, %arg1: memref<8x128xf32, #tpu.memory_space<vmem>>, %arg2: memref<128x4xf32, #tpu.memory_space<vmem>>, %arg3: memref<1x1xf32, #tpu.memory_space<smem>>, %arg4: memref<8x4xf32, #tpu.memory_space<vmem>>) attributes {dimension_semantics = [#tpu.dimension_semantics<parallel>], iteration_bounds = array<i64: 2>, scalar_prefetch = 0 : i64, scratch_operands = 0 : i64, tpu.core_type = #tpu.core_type<tc>, window_params = [{transform_indices = @transform_0, window_bounds = array<i64: 8, 128>}, {pipeline_mode = #tpu.pipeline_mode<synchronous>, transform_indices = @transform_1, window_bounds = array<i64: 128, 4>}, {transform_indices = @transform_2, window_bounds = array<i64: 1, 1>}, {transform_indices = @transform_3, window_bounds = array<i64: 8, 4>}]} {
    %c0 = arith.constant 0 : index
    %c0_0 = arith.constant 0 : index
    %0 = vector.load %arg1[%c0, %c0_0] : memref<8x128xf32, #tpu.memory_space<vmem>>, vector<8x128xf32>
    %c0_1 = arith.constant 0 : index
    %c0_2 = arith.constant 0 : index
    %1 = vector.load %arg2[%c0_1, %c0_2] : memref<128x4xf32, #tpu.memory_space<vmem>>, vector<128x4xf32>
    %cst = arith.constant dense<0.000000e+00> : vector<8x4xf32>
    %2 = tpu.matmul %0, %1, %cst {dimension_numbers = #tpu.dot_dimension_numbers<[1], [0], [0], [1], [0, 0, 1, 1], [], []>} : vector<8x128xf32>, vector<128x4xf32>, vector<8x4xf32> -> vector<8x4xf32>
    %c0_3 = arith.constant 0 : index
    %c0_4 = arith.constant 0 : index
    %3 = memref.load %arg3[%c0_3, %c0_4] : memref<1x1xf32, #tpu.memory_space<smem>>
    %4 = vector.broadcast %3 : f32 to vector<8x4xf32>
    %5 = arith.addf %2, %4 : vector<8x4xf32>
    %c0_5 = arith.constant 0 : index
    %c0_6 = arith.constant 0 : index
    %6 = vector.load %arg4[%c0_5, %c0_6] : memref<8x4xf32, #tpu.memory_space<vmem>>, vector<8x4xf32>
    tpu.vector_store %arg4[%c0_5, %c0_6], %5 {strides = array<i32>} : memref<8x4xf32, #tpu.memory_space<vmem>>, vector<8x4xf32>,
    return
  }
  func.func @transform_0(%arg0: i32) -> (i32, i32) {
    %c0_i32 = arith.constant 0 : i32
    %c0_i32_0 = arith.constant 0 : i32
    return %arg0, %c0_i32 : i32, i32
  }
  func.func @transform_1(%arg0: i32) -> (i32, i32) {
    %c0_i32 = arith.constant 0 : i32
    %c0_i32_0 = arith.constant 0 : i32
    %c0_i32_1 = arith.constant 0 : i32
    return %c0_i32, %c0_i32_0 : i32, i32
  }
  func.func @transform_2(%arg0: i32) -> (i32, i32) {
    %c0_i32 = arith.constant 0 : i32
    %c0_i32_0 = arith.constant 0 : i32
    %c0_i32_1 = arith.constant 0 : i32
    return %c0_i32, %c0_i32_0 : i32, i32
  }
  func.func @transform_3(%arg0: i32) -> (i32, i32) {
    %c0_i32 = arith.constant 0 : i32
    %c0_i32_0 = arith.constant 0 : i32
    return %arg0, %c0_i32 : i32, i32
  }
}

</mosaic_0001>

<bundles_post_ra>
// kernel: tpu_custom_call.1
= control target key start
LH: loop header
LB: loop body
LE: loop exit
PB: predicated region body
PF: predicated region fallthrough
CT: control target
= control target key end

     0   :  { %s441_s14 = smov 0   ;;  %s510_s0 = inlined_call_operand.vmem [shape: f32[10,128], index: 0, kind: input, shape index: {}]   ;;  %s511_s1 = inlined_call_operand.vmem [shape: f32[128,4], index: 1, kind: input, shape index: {}]   ;;  %s512_s2 = inlined_call_operand.<no memory space> [shape: f32[1,1], index: 2, kind: input, shape index: {}]   ;;  %s513_s3 = inlined_call_operand.vmem [shape: f32[10,4], index: 3, kind: output, shape index: {}]  }
   0x1   :  { %8 = sst [smem:[#allocation2]] %s512_s2 }
   0x2 LB: > { %s311_s15 = sadd.s32 4294967295, %s413_s14   ;;  %p315_p0 = scmp.ge.s32.totalorder %s413_s14, 1  ;;  %s413_s14 = sphi %s441_s14, %s14_s14  }
   0x3   : > { %p137_p1 = scmp.lt.s32.totalorder %s413_s14, 3 }
   0x5   : > { %p138_p2 = pnand %p315_p0, %p137_p1 }
   0x6   : > { %v168_v0 = vld [vmem:[%s511_s1] sm:$0xff] (!%p138_p2)  ;;  %v169_v1 = vld [vmem:[%s511_s1 + $0x8] sm:$0xff] (!%p138_p2)  ;;  %v170_v2 = vld [vmem:[%s511_s1 + $0x10] sm:$0xff] (!%p138_p2)  ;;  %v415_v3 = vmov (!%p138_p2), 0.0|0.0   ;;  %vm416_vm0 = vmmov (!%p138_p2), 0   ;;  %v417_v6 = vmov (!%p138_p2), 0.0  }
   0x7   : > { %141 = sbr.rel (%p138_p2) target bundleno = 255 (0xff), region = 32  ;;  %372 = vmatprep.subr.bf16.mxu0 (!%p138_p2), %v415_v3  ;;  %v373_v4 = vpack.c.bf16 (!%p138_p2), %v169_v1, %v168_v0  ;;  %v171_v5 = vld [vmem:[%s511_s1 + $0x18] sm:$0xff] (!%p138_p2)  ;;  %369 = vmatprep.mubr.msk.f32.mxu0 (!%p138_p2), %vm416_vm0, %v417_v6  ;;  %v172_v8 = vld [vmem:[%s511_s1 + $0x20] sm:$0xff] (!%p138_p2)  ;;  %v173_v9 = vld [vmem:[%s511_s1 + $0x28] sm:$0xff] (!%p138_p2)  ;;  %p159_p3 = scmp.lt.s32.totalorder (!%p138_p2), %s311_s15, 1  ;;  %vm256_vm1 = vcmask (!%p138_p2), 31744  }
   0x8   : > { %v376_v7 = vpack.c.bf16 (!%p138_p2), %v171_v5, %v170_v2  ;;  %v379_v10 = vpack.c.bf16 (!%p138_p2), %v173_v9, %v172_v8  ;;  %v174_v11 = vld [vmem:[%s511_s1 + $0x30] sm:$0xff] (!%p138_p2)  ;;  %v175_v12 = vld [vmem:[%s511_s1 + $0x38] sm:$0xff] (!%p138_p2)  ;;  %v176_v14 = vld [vmem:[%s511_s1 + $0x40] sm:$0xff] (!%p138_p2)  ;;  %s184_s25 = sld [smem:[#allocation2]] (!%p138_p2) }
   0x9   : > { %374 = vmatpush3.bf16.msra.mxu0 (!%p138_p2), %v373_v4  ;;  %v382_v13 = vpack.c.bf16 (!%p138_p2), %v175_v12, %v174_v11  ;;  %v177_v15 = vld [vmem:[%s511_s1 + $0x48] sm:$0xff] (!%p138_p2)  ;;  %v178_v17 = vld [vmem:[%s511_s1 + $0x50] sm:$0xff] (!%p138_p2)  ;;  %v179_v18 = vld [vmem:[%s511_s1 + $0x58] sm:$0xff] (!%p138_p2) }
   0xa   : > { %375 = vmatprep.subr.bf16.mxu0 (!%p138_p2), %v415_v3  ;;  %v385_v16 = vpack.c.bf16 (!%p138_p2), %v177_v15, %v176_v14  ;;  %v388_v19 = vpack.c.bf16 (!%p138_p2), %v179_v18, %v178_v17  ;;  %v180_v20 = vld [vmem:[%s511_s1 + $0x60] sm:$0xff] (!%p138_p2)  ;;  %v181_v21 = vld [vmem:[%s511_s1 + $0x68] sm:$0xff] (!%p138_p2)  ;;  %v182_v23 = vld [vmem:[%s511_s1 + $0x70] sm:$0xff] (!%p138_p2) }
   0xb   : > { %v391_v22 = vpack.c.bf16 (!%p138_p2), %v181_v21, %v180_v20  ;;  %v183_v24 = vld [vmem:[%s511_s1 + $0x78] sm:$0xff] (!%p138_p2) }
   0xc   : > { %v394_v25 = vpack.c.bf16 (!%p138_p2), %v183_v24, %v182_v23 }
   0xd   : > { %377 = vmatpush3.bf16.msra.mxu0 (!%p138_p2), %v376_v7 }
   0xe   : > { %378 = vmatprep.subr.bf16.mxu0 %v415_v3  ;;  %s515_s15 = smov (!%p159_p3, %s311_s15), 1  ;;  %v185_v27 = vstv %s184_s25 }
   0xf   : > { %s316_s21 = sshll.u32 %s515_s15, 3 }
  0x10   : > { %s162_s24 = scalar_lea.vmem %s510_s0, %s316_s21  ;;  %s166_s28 = scalar_lea.vmem %s513_s3, %s316_s21 }
  0x11   : > { %380 = vmatpush3.bf16.msra.mxu0 %v379_v10  ;;  %v167_v26 = vld [vmem:[%s162_s24] sm:$0xff] }
  0x12   : > { %381 = vmatprep.subr.bf16.mxu0 %v415_v3 }
  0x15   : > { %383 = vmatpush3.bf16.msra.mxu0 %v382_v13 }
  0x16   : > { %384 = vmatprep.subr.bf16.mxu0 %v415_v3 }
  0x19   : > { %386 = vmatpush3.bf16.msra.mxu0 %v385_v16 }
  0x1a   : > { %387 = vmatprep.subr.bf16.mxu0 %v415_v3 }
  0x1d   : > { %389 = vmatpush3.bf16.msra.mxu0 %v388_v19 }
  0x1e   : > { %390 = vmatprep.subr.bf16.mxu0 %v415_v3 }
  0x21   : > { %392 = vmatpush3.bf16.msra.mxu0 %v391_v22 }
  0x22   : > { %393 = vmatprep.subr.bf16.mxu0 %v415_v3 }
  0x25   : > { %395 = vmatpush3.bf16.msra.mxu0 %v394_v25 }
  0x28   : > { %370 = vmatmul.mubr.f32.vlgmr.msra.gmra.mrb[0].mxu0 %v167_v26 }
  0xfb   : > { %v252_v28 = vpop.f32.mrb[0].mxu0 }
  0xfc   : > { %v253_v29 = vadd.f32 %v252_v28, %v185_v27  ;;  %v371_v30 = vpop.f32.mrb[1].mxu0 }
  0xfe   : > { %257 = vst.msk [vmem:[%s166_s28] sm:$0xff] %vm256_vm1, %v253_v29 }
  0xff PF: > { %s14_s14 = sadd.s32 1, %s413_s14  }
 0x100   : > { %p11_p4 = scmp.ge.s32.totalorder %s14_s14, 4  }
 0x102   :  { %13 = sbr.rel (!%p11_p4) target bundleno = 2 (0x2), region = 62 }

</bundles_post_ra>
